<compile_context>
chip_gen: v6e
topology: v6e:2x2x1
jax: 0.10.0
libtpu: 0.0.40
codegen_flags: <defaults>
</compile_context>

<pallas_src>
import jax
import jax.numpy as jnp
from jax.experimental import pallas as pl
from jax.experimental.pallas import tpu as pltpu


def _identity_kernel(x_ref, o_ref):
    # Pure pass-through of the current tile: VMEM load -> VMEM store.
    o_ref[...] = x_ref[...]


def _sublane_multiple(dtype) -> int:
    """Sublane rounding for packed dtypes (bf16 packs [16,128], int8 [32,128])."""
    itemsize = jnp.dtype(dtype).itemsize
    if itemsize >= 4:
        return 8
    if itemsize == 2:
        return 16
    return 32


def _pick_lane_width(total: int, fallback: int) -> int:
    """Largest multiple of 128 (capped at 4096) that divides `total`.

    Falls back to the original trailing dim when no such factor exists."""
    best = 0
    w = 128
    cap = min(total, 4096)
    while w <= cap:
        if total % w == 0:
            best = w
        w += 128
    return best if best else fallback


def identity(x, *, target_block_bytes: int = 2 << 20):
    """JAX/Pallas equivalent of Identity.forward: returns input unchanged.

    Note: the truly optimal Identity is simply `return x`; the pallas_call
    below demonstrates the aliased, pipelined pass-through form."""
    # Degenerate cases: nothing worth launching a kernel for.
    if x.ndim == 0 or x.size == 0:
        return x

    orig_shape = x.shape
    dtype = x.dtype
    itemsize = jnp.dtype(dtype).itemsize
    total = x.size

    # ---- lane-dense slab (metadata-only reshape in the wrapper) ----
    n = _pick_lane_width(total, orig_shape[-1])
    m = total // n
    x2 = x.reshape(m, n)

    # ---- byte-sized tiles ----
    sublane = _sublane_multiple(dtype)

    # Lane tile: full extent unless a single row-group would blow the budget;
    # then a 128-multiple tile (cdiv grid handles the ragged edge).
    lane_budget_elems = max(128, ((target_block_bytes // itemsize) // 128) * 128)
    tn = n if (n <= lane_budget_elems or n <= 128) else lane_budget_elems

    # Row tile: ~target_block_bytes per block, rounded to the sublane multiple.
    row_bytes = max(tn * itemsize, 1)
    tm = max(sublane, ((target_block_bytes // row_bytes) // sublane) * sublane)
    if tm >= m:
        tm = m  # full extent: always legal regardless of divisibility

    grid = (pl.cdiv(m, tm), pl.cdiv(n, tn))

    out2 = pl.pallas_call(
        _identity_kernel,
        out_shape=jax.ShapeDtypeStruct((m, n), dtype),
        grid=grid,
        in_specs=[pl.BlockSpec((tm, tn), lambda i, j: (i, j))],
        out_specs=pl.BlockSpec((tm, tn), lambda i, j: (i, j)),
        input_output_aliases={0: 0},  # output aliases input: no new HBM buffer
        compiler_params=pltpu.CompilerParams(
            dimension_semantics=("parallel", "parallel"),
            vmem_limit_bytes=32 << 20,  # headroom above v5e's 16 MiB default
        ),
    )(x2)

    return out2.reshape(orig_shape)


if __name__ == "__main__":
    key = jax.random.PRNGKey(0)

    # Primary test: small shape consistent with a generic dataset transform.
    x = jax.random.normal(key, (2, 4, 16, 16), dtype=jnp.float32)
    y = identity(x)
    jax.block_until_ready(y)
    assert y.shape == x.shape, "shape mismatch"
    assert y.dtype == x.dtype, "dtype mismatch"
    assert jnp.array_equal(y, x), "value mismatch"

    # Fallback path: element count not divisible by 128 (ragged slab).
    x_odd = jax.random.normal(jax.random.PRNGKey(1), (3, 5, 7), dtype=jnp.float32)
    y_odd = identity(x_odd)
    jax.block_until_ready(y_odd)
    assert y_odd.shape == x_odd.shape and y_odd.dtype == x_odd.dtype
    assert jnp.array_equal(y_odd, x_odd), "value mismatch (ragged path)"

    # Packed-dtype path: bf16 uses a 16-row sublane multiple.
    x_bf16 = jax.random.normal(jax.random.PRNGKey(2), (2, 8, 128)).astype(jnp.bfloat16)
    y_bf16 = identity(x_bf16)
    jax.block_until_ready(y_bf16)
    assert y_bf16.shape == x_bf16.shape and y_bf16.dtype == x_bf16.dtype
    assert jnp.array_equal(y_bf16, x_bf16), "value mismatch (bf16 path)"

    print("KERNEL_OK")
</pallas_src>

<mosaic_0001>
module attributes {stable_mosaic.version = 11 : i64} {
  func.func @_identity_kernel(%arg0: i32, %arg1: i32, %arg2: memref<1x2048xf32, #tpu.memory_space<vmem>>, %arg3: memref<1x2048xf32, #tpu.memory_space<vmem>>) attributes {dimension_semantics = [#tpu.dimension_semantics<parallel>, #tpu.dimension_semantics<parallel>], iteration_bounds = array<i64: 1, 1>, scalar_prefetch = 0 : i64, scratch_operands = 0 : i64, tpu.core_type = #tpu.core_type<tc>, window_params = [{transform_indices = @transform_0, window_bounds = array<i64: 1, 2048>}, {transform_indices = @transform_1, window_bounds = array<i64: 1, 2048>}]} {
    %c0 = arith.constant 0 : index
    %c0_0 = arith.constant 0 : index
    %0 = vector.load %arg2[%c0, %c0_0] : memref<1x2048xf32, #tpu.memory_space<vmem>>, vector<1x2048xf32>
    %c0_1 = arith.constant 0 : index
    %c0_2 = arith.constant 0 : index
    %1 = vector.load %arg3[%c0_1, %c0_2] : memref<1x2048xf32, #tpu.memory_space<vmem>>, vector<1x2048xf32>
    tpu.vector_store %arg3[%c0_1, %c0_2], %0 {strides = array<i32>} : memref<1x2048xf32, #tpu.memory_space<vmem>>, vector<1x2048xf32>,
    return
  }
  func.func @transform_0(%arg0: i32, %arg1: i32) -> (i32, i32) {
    %c0_i32 = arith.constant 0 : i32
    return %arg0, %arg1 : i32, i32
  }
  func.func @transform_1(%arg0: i32, %arg1: i32) -> (i32, i32) {
    %c0_i32 = arith.constant 0 : i32
    return %arg0, %arg1 : i32, i32
  }
}

</mosaic_0001>

<bundles_post_ra>
// kernel: tpu_custom_call.1
= control target key start
LH: loop header
LB: loop body
LE: loop exit
PB: predicated region body
PF: predicated region fallthrough
CT: control target
= control target key end

     0   :  { %6 = vsyncpa [#allocation3], 0  ;;  %s104_s0 = inlined_call_operand.hbm [shape: f32[1,2048], index: 0, kind: input, shape index: {}, may-alias: {0,1}]   ;;  %s105_s1 = inlined_call_operand.hbm [shape: f32[1,2048], index: 1, kind: output, shape index: {}, may-alias: {0,1}]  }
   0x1   :  { %7 = vsyncpa [#allocation4], 0  ;;  %s86_s6 = smov [#allocation2]  }
   0x2   :  { %s14_s7 = sshll.u32 %s86_s6, 4  ;;  %s15_s7 = int_to_ptr.vmem [resolvable:$true] %s14_s7 }
   0x3   :  { %s50_s8 = scalar_lea.vmem %s15_s7, 256  ;;  %p55_p1 = scmp.lt.s32.totalorder %s15_s7, %s15_s7 }
   0x4   :  { %p51_p0 = scmp.ne.s32.totalorder %s15_s7, %s50_s8  ;;  %p56_p2 = scmp.lt.s32.totalorder %s50_s8, %s50_s8 }
   0x6   :  { %p57_p3 = por %p56_p2, %p55_p1 }
   0x8   :  { %p58_p4 = pnand %p57_p3, %p51_p0 }
   0xa   :  { %61 = shalt.err (!%p58_p4)
}
   0xb   :  { %17 = dma.hbm_to_vmem [thread:$0]  %s104_s0, 256, %s15_s7, [#allocation3]  }
   0xc   :  { %82 = dma.done.wait [#allocation3], 256  }
   0xd   :  { %83 = vsyncadd [#allocation3], 4294967040  ;;  %s87_s11 = smov [#allocation5]   ;;  %v21_v0 = vld [vmem:[#allocation2] sm:$0xff]  ;;  %v22_v1 = vld [vmem:[#allocation2 + $0x8] sm:$0xff] }
   0xe   :  { %s31_s12 = sshll.u32 %s87_s11, 4  ;;  %23 = vst [vmem:[#allocation5] sm:$0xff] %v21_v0  ;;  %24 = vst [vmem:[#allocation5 + $0x8] sm:$0xff] %v22_v1  ;;  %s32_s12 = int_to_ptr.vmem [resolvable:$true] %s31_s12 }
   0xf   :  { %s62_s13 = scalar_lea.vmem %s32_s12, 256  ;;  %p67_p6 = scmp.lt.s32.totalorder %s32_s12, %s32_s12 }
  0x10   :  { %p63_p5 = scmp.ne.s32.totalorder %s32_s12, %s62_s13  ;;  %p68_p7 = scmp.lt.s32.totalorder %s62_s13, %s62_s13 }
  0x12   :  { %p69_p8 = por %p68_p7, %p67_p6 }
  0x14   :  { %p70_p9 = pnand %p69_p8, %p63_p5 }
  0x16   :  { %73 = shalt.err (!%p70_p9)
}
  0x17   :  { %34 = dma.vmem_to_hbm [thread:$0]  %s32_s12, 256, %s105_s1, [#allocation4]  }
  0x18   :  { %84 = dma.done.wait [#allocation4], 256  }
  0x19   :  { %85 = vsyncadd [#allocation4], 4294967040 }
  0x1a   :  { %38 = vsyncpa [#allocation3], 1 }
  0x1b   :  { %39 = vsyncpa [#allocation4], 1 }

</bundles_post_ra>
